<compile_context>
chip_gen: v5e
topology: v5e:2x2
jax: 0.10.0
libtpu: 0.0.40
codegen_flags: <defaults>
</compile_context>

<pallas_src>
import jax
import jax.numpy as jnp
import numpy as np
from jax.experimental import pallas as pl
from jax.experimental.pallas import tpu as pltpu


# -----------------------------------------------------------------------------
# 1) Production forward: identity at the JAX level (fastest correct impl).
# -----------------------------------------------------------------------------
def estimate_p_forward(estimated_p: jax.Array) -> jax.Array:
    """EstimateP.forward() is literally `return self.estimated_P`."""
    return estimated_p


# -----------------------------------------------------------------------------
# 2) Optional explicit op boundary via custom_vjp (no kernel launch).
# -----------------------------------------------------------------------------
@jax.custom_vjp
def estimate_p_forward_boundary(estimated_p: jax.Array) -> jax.Array:
    return estimated_p


def _ep_fwd(estimated_p):
    return estimated_p, None


def _ep_bwd(_, g):
    return (g,)


estimate_p_forward_boundary.defvjp(_ep_fwd, _ep_bwd)


# -----------------------------------------------------------------------------
# 3) Recommended integration: scalar consumed inside a real Pallas kernel as a
#    (1,) SMEM input — demonstrates the "no standalone launch" pattern.
# -----------------------------------------------------------------------------
def _scale_by_p_kernel(p_ref, x_ref, o_ref):
    # p_ref lives in SMEM; p_ref[0] is a free scalar-slot read inside the
    # consumer's bundle. The multiply runs on the VPU over the VMEM tile.
    o_ref[...] = x_ref[...] * p_ref[0]


def scale_by_estimated_p(estimated_p: jax.Array, x: jax.Array) -> jax.Array:
    """Example consumer kernel: y = estimated_P * x, scalar fed via SMEM."""
    m, n = x.shape
    return pl.pallas_call(
        _scale_by_p_kernel,
        out_shape=jax.ShapeDtypeStruct((m, n), x.dtype),
        in_specs=[
            pl.BlockSpec(memory_space=pltpu.SMEM),      # (1,) scalar in SMEM
            pl.BlockSpec((m, n), lambda: (0, 0)),       # full tile in VMEM
        ],
        out_specs=pl.BlockSpec((m, n), lambda: (0, 0)),
    )(estimated_p, x)


# -----------------------------------------------------------------------------
# 4) Quarantined kernel-boundary variant of the literal forward() (not a hot
#    path). SMEM-only scalar copy; no aliasing, no VMEM, no grid.
# -----------------------------------------------------------------------------
def _estimate_p_kernel(p_ref, o_ref):
    o_ref[0] = p_ref[0]


def estimate_p_forward_kernel(estimated_p: jax.Array) -> jax.Array:
    return pl.pallas_call(
        _estimate_p_kernel,
        out_shape=jax.ShapeDtypeStruct((1,), jnp.float32),
        in_specs=[pl.BlockSpec(memory_space=pltpu.SMEM)],
        out_specs=pl.BlockSpec(memory_space=pltpu.SMEM),
    )(estimated_p)


def init_estimate_p_params() -> jax.Array:
    # torch.nn.init.constant_(self.estimated_P.data, 1.0) on a FloatTensor(1)
    return jnp.ones((1,), dtype=jnp.float32)


if __name__ == "__main__":
    key = jax.random.PRNGKey(0)
    estimated_p = init_estimate_p_params()

    # --- production path: identity (matches EstimateP.forward exactly) ------
    out_identity = jax.block_until_ready(estimate_p_forward(estimated_p))

    # --- op-boundary path: custom_vjp identity ------------------------------
    out_boundary = jax.block_until_ready(estimate_p_forward_boundary(estimated_p))

    # --- quarantined Pallas boundary variant (run once for coverage) --------
    out_kernel = jax.block_until_ready(estimate_p_forward_kernel(estimated_p))

    # --- integration demo: scalar consumed in-kernel via SMEM ---------------
    x_demo = jax.random.normal(key, (8, 128), dtype=jnp.float32)
    y_demo = jax.block_until_ready(scale_by_estimated_p(estimated_p, x_demo))

    # Correctness checks (host transfers only here, outside any timed path).
    assert out_identity.shape == (1,) and out_identity.dtype == jnp.float32
    assert out_boundary.shape == (1,) and out_boundary.dtype == jnp.float32
    assert out_kernel.shape == (1,) and out_kernel.dtype == jnp.float32
    np.testing.assert_allclose(np.asarray(out_identity), np.asarray([1.0]))
    np.testing.assert_allclose(np.asarray(out_boundary), np.asarray([1.0]))
    np.testing.assert_allclose(np.asarray(out_kernel), np.asarray([1.0]))
    np.testing.assert_allclose(
        np.asarray(y_demo),
        np.asarray(x_demo) * 1.0,
        rtol=1e-6,
        atol=1e-6,
    )

    # Gradient boundary sanity check: d/dp (p) == 1.
    grad_p = jax.block_until_ready(
        jax.grad(lambda p: jnp.sum(estimate_p_forward_boundary(p)))(estimated_p)
    )
    np.testing.assert_allclose(np.asarray(grad_p), np.asarray([1.0]))

    print("KERNEL_OK")
</pallas_src>

<mosaic_0001>
module attributes {stable_mosaic.version = 11 : i64} {
  func.func @_estimate_p_kernel(%arg0: memref<1xf32, #tpu.memory_space<smem>>, %arg1: memref<1xf32, #tpu.memory_space<smem>>) attributes {dimension_semantics = [], scalar_prefetch = 0 : i64, scratch_operands = 0 : i64, tpu.core_type = #tpu.core_type<tc>} {
    %c0 = arith.constant 0 : index
    %0 = memref.load %arg0[%c0] : memref<1xf32, #tpu.memory_space<smem>>
    %c0_0 = arith.constant 0 : index
    %1 = memref.load %arg1[%c0_0] : memref<1xf32, #tpu.memory_space<smem>>
    memref.store %0, %arg1[%c0_0] : memref<1xf32, #tpu.memory_space<smem>>
    return
  }
}

</mosaic_0001>

<bundles_post_ra>
// kernel: tpu_custom_call.1
= control target key start
LH: loop header
LB: loop body
LE: loop exit
PB: predicated region body
PF: predicated region fallthrough
CT: control target
= control target key end

     0   :  { %7 = vsyncpa [#allocation4], 0  ;;  %s43_s11 = smov [#allocation3]   ;;  %s60_s0 = inlined_call_operand.<no memory space> [shape: f32[1], index: 0, kind: input, shape index: {}]   ;;  %s61_s1 = inlined_call_operand.hbm [shape: f32[1], index: 1, kind: output, shape index: {}]  }
   0x1   :  { %12 = sst [smem:[#allocation3]] %s60_s0  ;;  %s18_s10 = sshll.u32 %s61_s1, 4  ;;  %s19_s10 = int_to_ptr.hbm [resolvable:$true] %s18_s10 }
   0x2   :  { %21 = dma.smem_to_hbm %s43_s11, 16, %s19_s10, [#allocation4]  }
   0x3   :  { %41 = dma.done.wait [#allocation4], 16  }
   0x4   :  { %42 = vsyncadd [#allocation4], 4294967280 }
   0x5   :  { %26 = sfence }
   0x6   :  { %27 = vsyncpa [#allocation4], 1 }

</bundles_post_ra>
